<compile_context>
chip_gen: v5e
topology: v5e:2x2
jax: 0.10.0
libtpu: 0.0.40
codegen_flags: <defaults>
</compile_context>

<pallas_src>
import functools
import math

import jax
import jax.numpy as jnp
from jax.experimental import pallas as pl
from jax.experimental.pallas import tpu as pltpu

# Module constants (from gpt.py)
BLOCK_SIZE = 256   # tril buffer size (only tril[:T, :T] is ever used)
N_EMBD = 192
DROPOUT = 0.2      # unused in eval mode


def _head_kernel(x_ref, w_ref, b_ref, o_ref, *, head_size):
    """One causal attention head for a block of BB batch elements.

    x_ref : (BB, T, C)   VMEM tile (bf16 or f32)
    w_ref : (C, 3H)      fused [Wk | Wq*scale | Wv], pre-transposed, same dtype as x
    b_ref : (1, 3H)      fused [bk | bq*scale | bv], f32
    o_ref : (BB, T, H)   VMEM tile, f32
    """
    BB, T, C = x_ref.shape
    H = head_size
    mxu_dt = x_ref.dtype   # bf16 on the fast path; f32 if mxu_dtype=None

    # Single fused projection matmul on the MXU: (BB*T, C) @ (C, 3H), f32 acc.
    x2d = x_ref[...].reshape(BB * T, C)
    kqv = jnp.dot(x2d, w_ref[...], preferred_element_type=jnp.float32)
    kqv = (kqv + b_ref[...]).reshape(BB, T, 3 * H)

    # Lane slices at offsets 0/H/2H inside the 3H=96-lane projection result.
    # (Sub-lane-tile slices; any relayout cost hides under the MXU.)
    k = kqv[:, :, 0:H].astype(mxu_dt)
    q = kqv[:, :, H:2 * H].astype(mxu_dt)   # 1/sqrt(H) already folded into Wq/bq
    v = kqv[:, :, 2 * H:3 * H].astype(mxu_dt)

    # Batched attention scores; contraction on the last dims of q and k
    # (lowers to dot_general, no explicit transpose of k through the XLU).
    s = jnp.einsum("bqd,bkd->bqk", q, k, preferred_element_type=jnp.float32)

    # Causal mask built in-kernel (== tril[:T, :T]).  Padded key columns
    # always satisfy col >= T_real > row for real query rows, so they are
    # masked off; padded query rows are sliced away in the wrapper.
    row = jax.lax.broadcasted_iota(jnp.int32, (T, T), 0)
    col = jax.lax.broadcasted_iota(jnp.int32, (T, T), 1)
    s = jnp.where((col <= row)[None, :, :], s, jnp.float32(-1e30))

    # Numerically stable softmax, kept entirely in f32.
    s = s - jnp.max(s, axis=-1, keepdims=True)
    e = jnp.exp(s)
    p = e * pl.reciprocal(jnp.sum(e, axis=-1, keepdims=True))  # exact recip (EUP)

    # Dropout: eval mode => identity (see TODO at top of file).

    out = jnp.einsum("bqk,bkd->bqd", p.astype(mxu_dt), v,
                     preferred_element_type=jnp.float32)
    o_ref[...] = out.astype(o_ref.dtype)


def _pick_bb(B):
    """Largest batch tile (<=16 for VMEM) dividing B that keeps grid >= 2.

    grid >= 2 lets the "parallel" batch axis be sharded across both
    TensorCores on v7x; v5e/v6e (1 TC) are unaffected.
    """
    for cand in (16, 8, 4, 2, 1):
        if B % cand == 0 and B // cand >= 2:
            return cand
    return B  # B == 1


def head_forward(x, wk, bk, wq, bq, wv, bv, *, mxu_dtype=jnp.bfloat16):
    """x: (B, T, C) float32; w*: (H, C) (PyTorch nn.Linear layout); b*: (H,).

    Returns out: (B, T, H) float32.
    mxu_dtype=bf16 feeds the MXU its native-rate operand type (f32 accumulate).
    Pass mxu_dtype=None for a pure-f32 path.
    """
    B, T, C = x.shape
    H = wk.shape[0]

    # Pad T up to a multiple of 8 (sublane).  Padded query rows are sliced off
    # afterwards; padded key columns are removed by the in-kernel causal mask.
    T_pad = ((T + 7) // 8) * 8
    if T_pad != T:
        x = jnp.pad(x, ((0, 0), (0, T_pad - T), (0, 0)))

    # Fuse the three projections and fold the softmax scale into Wq / bq.
    scale = 1.0 / math.sqrt(H)
    w_fused = jnp.concatenate([wk.T, wq.T * scale, wv.T], axis=1)        # (C, 3H)
    b_fused = jnp.concatenate([bk, bq * scale, bv]).reshape(1, 3 * H)    # (1, 3H) f32
    if mxu_dtype is not None:
        x = x.astype(mxu_dtype)
        w_fused = w_fused.astype(mxu_dtype)

    BB = _pick_bb(B)

    out = pl.pallas_call(
        functools.partial(_head_kernel, head_size=H),
        out_shape=jax.ShapeDtypeStruct((B, T_pad, H), jnp.float32),
        grid_spec=pltpu.PrefetchScalarGridSpec(
            num_scalar_prefetch=0,
            grid=(B // BB,),
            in_specs=[
                pl.BlockSpec((BB, T_pad, C), lambda b: (b, 0, 0)),   # x
                pl.BlockSpec((C, 3 * H), lambda b: (0, 0)),          # fused W
                pl.BlockSpec((1, 3 * H), lambda b: (0, 0)),          # fused b
            ],
            out_specs=pl.BlockSpec((BB, T_pad, H), lambda b: (b, 0, 0)),
        ),
        compiler_params=pltpu.CompilerParams(
            # Batch axis is embarrassingly parallel (v7x: sharded across 2 TCs).
            dimension_semantics=("parallel",),
            # Raised above v5e's 16 MiB scoped default so BB=16 tiles compile
            # on all generations (actual usage stays well below 64 MiB).
            vmem_limit_bytes=64 * 1024 * 1024,
        ),
    )(x, w_fused, b_fused)

    return out[:, :T, :] if T_pad != T else out


def head_reference(x, wk, bk, wq, bq, wv, bv):
    """Pure-JAX f32 reference of the PyTorch forward (eval mode)."""
    k = x @ wk.T + bk
    q = x @ wq.T + bq
    v = x @ wv.T + bv
    wei = (q @ jnp.swapaxes(k, -2, -1)) * (k.shape[-1] ** -0.5)
    T = x.shape[1]
    tril = jnp.tril(jnp.ones((T, T), dtype=bool))
    wei = jnp.where(tril, wei, -jnp.inf)
    wei = jax.nn.softmax(wei, axis=-1)
    return wei @ v


if __name__ == "__main__":
    # Small, shape-consistent example: B=2, T=8, C=n_embd=192, head_size=32.
    B, T, C, HEAD_SIZE = 2, 8, N_EMBD, 32

    key = jax.random.PRNGKey(0)
    kx, kk, kbk, kq, kbq, kv, kbv = jax.random.split(key, 7)

    x = jax.random.normal(kx, (B, T, C), dtype=jnp.float32)

    # Deterministic nn.Linear-style init: U(-1/sqrt(in), 1/sqrt(in)).
    bound = 1.0 / math.sqrt(C)
    wk = jax.random.uniform(kk, (HEAD_SIZE, C), jnp.float32, -bound, bound)
    bk = jax.random.uniform(kbk, (HEAD_SIZE,), jnp.float32, -bound, bound)
    wq = jax.random.uniform(kq, (HEAD_SIZE, C), jnp.float32, -bound, bound)
    bq = jax.random.uniform(kbq, (HEAD_SIZE,), jnp.float32, -bound, bound)
    wv = jax.random.uniform(kv, (HEAD_SIZE, C), jnp.float32, -bound, bound)
    bv = jax.random.uniform(kbv, (HEAD_SIZE,), jnp.float32, -bound, bound)

    out = head_forward(x, wk, bk, wq, bq, wv, bv)
    out = jax.block_until_ready(out)

    ref = head_reference(x, wk, bk, wq, bq, wv, bv)
    assert out.shape == (B, T, HEAD_SIZE), out.shape
    # Tolerance accounts for bf16 MXU operands (f32 accumulate) vs f32 reference.
    assert jnp.allclose(out, ref, atol=2e-2, rtol=2e-2), float(
        jnp.max(jnp.abs(out - ref))
    )

    print("KERNEL_OK")
</pallas_src>

<mosaic_0001>
module attributes {stable_mosaic.version = 11 : i64} {
  func.func @_head_kernel(%arg0: i32, %arg1: memref<1x8x192xbf16, #tpu.memory_space<vmem>>, %arg2: memref<192x96xbf16, #tpu.memory_space<vmem>>, %arg3: memref<1x96xf32, #tpu.memory_space<vmem>>, %arg4: memref<1x8x32xf32, #tpu.memory_space<vmem>>) attributes {dimension_semantics = [#tpu.dimension_semantics<parallel>], iteration_bounds = array<i64: 2>, scalar_prefetch = 0 : i64, scratch_operands = 0 : i64, tpu.core_type = #tpu.core_type<tc>, window_params = [{transform_indices = @transform_0, window_bounds = array<i64: 1, 8, 192>}, {pipeline_mode = #tpu.pipeline_mode<synchronous>, transform_indices = @transform_1, window_bounds = array<i64: 192, 96>}, {pipeline_mode = #tpu.pipeline_mode<synchronous>, transform_indices = @transform_2, window_bounds = array<i64: 1, 96>}, {transform_indices = @transform_3, window_bounds = array<i64: 1, 8, 32>}]} {
    %c0 = arith.constant 0 : index
    %c0_0 = arith.constant 0 : index
    %c0_1 = arith.constant 0 : index
    %0 = vector.load %arg1[%c0, %c0_0, %c0_1] : memref<1x8x192xbf16, #tpu.memory_space<vmem>>, vector<1x8x192xbf16>
    %1 = vector.shape_cast %0 : vector<1x8x192xbf16> to vector<8x192xbf16>
    %c0_2 = arith.constant 0 : index
    %c0_3 = arith.constant 0 : index
    %2 = vector.load %arg2[%c0_2, %c0_3] : memref<192x96xbf16, #tpu.memory_space<vmem>>, vector<192x96xbf16>
    %cst = arith.constant dense<0.000000e+00> : vector<8x96xf32>
    %3 = tpu.matmul %1, %2, %cst {dimension_numbers = #tpu.dot_dimension_numbers<[1], [0], [0], [1], [0, 0, 1, 1], [], []>} : vector<8x192xbf16>, vector<192x96xbf16>, vector<8x96xf32> -> vector<8x96xf32>
    %c0_4 = arith.constant 0 : index
    %c0_5 = arith.constant 0 : index
    %4 = vector.load %arg3[%c0_4, %c0_5] : memref<1x96xf32, #tpu.memory_space<vmem>>, vector<1x96xf32>
    %5 = vector.broadcast %4 : vector<1x96xf32> to vector<8x96xf32>
    %6 = arith.addf %3, %5 : vector<8x96xf32>
    %7 = vector.shape_cast %6 : vector<8x96xf32> to vector<1x8x96xf32>
    %8 = vector.extract_strided_slice %7 {offsets = [0, 0, 0], sizes = [1, 8, 32], strides = [1, 1, 1]} : vector<1x8x96xf32> to vector<1x8x32xf32>
    %9 = arith.truncf %8 : vector<1x8x32xf32> to vector<1x8x32xbf16>
    %10 = vector.extract_strided_slice %7 {offsets = [0, 0, 32], sizes = [1, 8, 32], strides = [1, 1, 1]} : vector<1x8x96xf32> to vector<1x8x32xf32>
    %11 = arith.truncf %10 : vector<1x8x32xf32> to vector<1x8x32xbf16>
    %12 = vector.extract_strided_slice %7 {offsets = [0, 0, 64], sizes = [1, 8, 32], strides = [1, 1, 1]} : vector<1x8x96xf32> to vector<1x8x32xf32>
    %13 = arith.truncf %12 : vector<1x8x32xf32> to vector<1x8x32xbf16>
    "tpu.trace_start"() <{level = 10 : i32, message = "bqd,bkd->bqk"}> : () -> ()
    %cst_6 = arith.constant dense<0.000000e+00> : vector<1x8x8xf32>
    %14 = tpu.matmul %11, %9, %cst_6 {dimension_numbers = #tpu.dot_dimension_numbers<[2], [2], [1], [1], [0, 0, 0, 1, 1, 1], [0], [0]>} : vector<1x8x32xbf16>, vector<1x8x32xbf16>, vector<1x8x8xf32> -> vector<1x8x8xf32>
    "tpu.trace_stop"() : () -> ()
    %15 = tpu.iota {dimensions = array<i32: 0>} : vector<8x8xi32>
    %16 = tpu.iota {dimensions = array<i32: 1>} : vector<8x8xi32>
    %17 = arith.cmpi sle, %16, %15 : vector<8x8xi32>
    %18 = vector.shape_cast %17 : vector<8x8xi1> to vector<1x8x8xi1>
    %cst_7 = arith.constant -1.000000e+30 : f32
    %19 = vector.broadcast %cst_7 : f32 to vector<1x8x8xf32>
    %20 = arith.select %18, %14, %19 : vector<1x8x8xi1>, vector<1x8x8xf32>
    %cst_8 = arith.constant dense<0xFF800000> : vector<1x8xf32>
    %21 = vector.multi_reduction <maximumf>, %20, %cst_8 [2] : vector<1x8x8xf32> to vector<1x8xf32>
    %22 = vector.shape_cast %21 : vector<1x8xf32> to vector<1x8x1xf32>
    %23 = vector.broadcast %22 : vector<1x8x1xf32> to vector<1x8x8xf32>
    %24 = arith.subf %20, %23 : vector<1x8x8xf32>
    %25 = math.exp %24 : vector<1x8x8xf32>
    %cst_9 = arith.constant dense<0.000000e+00> : vector<1x8xf32>
    %26 = vector.multi_reduction <add>, %25, %cst_9 [2] : vector<1x8x8xf32> to vector<1x8xf32>
    %27 = vector.shape_cast %26 : vector<1x8xf32> to vector<1x8x1xf32>
    %28 = tpu.reciprocal %27 : vector<1x8x1xf32> -> vector<1x8x1xf32>
    %29 = vector.broadcast %28 : vector<1x8x1xf32> to vector<1x8x8xf32>
    %30 = arith.mulf %25, %29 : vector<1x8x8xf32>
    %31 = arith.truncf %30 : vector<1x8x8xf32> to vector<1x8x8xbf16>
    "tpu.trace_start"() <{level = 10 : i32, message = "bqk,bkd->bqd"}> : () -> ()
    %cst_10 = arith.constant dense<0.000000e+00> : vector<1x8x32xf32>
    %32 = tpu.matmul %31, %13, %cst_10 {dimension_numbers = #tpu.dot_dimension_numbers<[2], [1], [1], [2], [0, 0, 0, 1, 1, 2], [0], [0]>} : vector<1x8x8xbf16>, vector<1x8x32xbf16>, vector<1x8x32xf32> -> vector<1x8x32xf32>
    "tpu.trace_stop"() : () -> ()
    %c0_11 = arith.constant 0 : index
    %c0_12 = arith.constant 0 : index
    %c0_13 = arith.constant 0 : index
    %33 = vector.load %arg4[%c0_11, %c0_12, %c0_13] : memref<1x8x32xf32, #tpu.memory_space<vmem>>, vector<1x8x32xf32>
    tpu.vector_store %arg4[%c0_11, %c0_12, %c0_13], %32 {strides = array<i32>} : memref<1x8x32xf32, #tpu.memory_space<vmem>>, vector<1x8x32xf32>,
    return
  }
  func.func @transform_0(%arg0: i32) -> (i32, i32, i32) {
    %c0_i32 = arith.constant 0 : i32
    %c0_i32_0 = arith.constant 0 : i32
    %c0_i32_1 = arith.constant 0 : i32
    return %arg0, %c0_i32, %c0_i32_0 : i32, i32, i32
  }
  func.func @transform_1(%arg0: i32) -> (i32, i32) {
    %c0_i32 = arith.constant 0 : i32
    %c0_i32_0 = arith.constant 0 : i32
    %c0_i32_1 = arith.constant 0 : i32
    return %c0_i32, %c0_i32_0 : i32, i32
  }
  func.func @transform_2(%arg0: i32) -> (i32, i32) {
    %c0_i32 = arith.constant 0 : i32
    %c0_i32_0 = arith.constant 0 : i32
    %c0_i32_1 = arith.constant 0 : i32
    return %c0_i32, %c0_i32_0 : i32, i32
  }
  func.func @transform_3(%arg0: i32) -> (i32, i32, i32) {
    %c0_i32 = arith.constant 0 : i32
    %c0_i32_0 = arith.constant 0 : i32
    %c0_i32_1 = arith.constant 0 : i32
    return %arg0, %c0_i32, %c0_i32_0 : i32, i32, i32
  }
}

</mosaic_0001>

<bundles_post_ra>
// kernel: tpu_custom_call.1
= control target key start
LH: loop header
LB: loop body
LE: loop exit
PB: predicated region body
PF: predicated region fallthrough
CT: control target
= control target key end

     0   :  { %8 = vsyncpa [#allocation3], 0  ;;  %s972_s0 = inlined_call_operand.hbm [shape: bf16[2,8,192], index: 0, kind: input, shape index: {}]   ;;  %s973_s1 = inlined_call_operand.hbm [shape: bf16[192,96], index: 1, kind: input, shape index: {}]   ;;  %s974_s2 = inlined_call_operand.vmem [shape: f32[1,96], index: 2, kind: input, shape index: {}]   ;;  %s975_s3 = inlined_call_operand.hbm [shape: f32[2,8,32], index: 3, kind: output, shape index: {}]  }
   0x1   :  { %10 = vsyncpa [#allocation3 + $0x1], 0 }
   0x2   :  { %11 = vsyncpa [#allocation6], 0 }
   0x3   :  { %12 = vsyncpa [#allocation4], 0 }
   0x4   :  { %14 = vsyncpa [#allocation4 + $0x1], 0  ;;  %s823_s12 = smov 0   ;;  %s825_s13 = smov 0  }
   0x5   :  { %s827_s14 = smov 0   ;;  %s829_s15 = smov 0  }
   0x6 LB: > { %s130_s18 = sshll.u32 %s973_s1, 4  ;;  %s847_s19 = sadd.s32 4294967295, %s796_s15   ;;  %s796_s15 = sphi %s829_s15, %s985_s15   ;;  %s792_s14 = sphi %s827_s14, %s984_s14   ;;  %s788_s13 = sphi %s825_s13, %s983_s13   ;;  %s784_s12 = sphi %s823_s12, %s982_s12   ;;  %s131_s18 = int_to_ptr.hbm [resolvable:$true] %s130_s18 }
   0x7   : > { %p522_p0 = scmp.ge.s32.totalorder %s796_s15, 1  ;;  %p41_p1 = scmp.eq.s32.totalorder %s847_s19, 0 }
   0x8   : > { %p119_p2 = scmp.lt.s32.totalorder %s796_s15, 3  ;;  %s798_s21 = smov [#allocation5]  }
   0x9   : > { %s132_s22 = sshll.u32 %s798_s21, 4  ;;  %s799_s23 = smov 64   ;;  %s133_s22 = int_to_ptr.vmem [resolvable:$true] %s132_s22 }
   0xa   : > { %p852_p3 = pnand %p522_p0, %p119_p2  ;;  %s800_s24 = smov 4  }
   0xb   : > { %s521_s25 = sadd.s32 4294967294, %s796_s15   ;;  %s863_s26 = sadd.s32 1, %s796_s15  }
   0xc   : > { %p608_p4 = pneg %p852_p3  ;;  %s27_s27 = sadd.s32 1, %s792_s14 }
   0xd   : > { %s24_s28 = ssub.s32 %s796_s15, %s863_s26  ;;  %p34_p7 = scmp.ne.s32.totalorder %s792_s14, %s788_s13 }
   0xe   : > { %p609_p6 = pnand %p608_p4, %p41_p1  ;;  %p25_p8 = scmp.eq.s32.totalorder %s24_s28, 0 }
   0xf   : > { %p35_p9 = scmp.eq.s32.totalorder %s796_s15, 0  ;;  %p40_p10 = scmp.ne.s32.totalorder %s788_s13, %s784_s12 }
  0x10   : > { %611 = dma.hbm_to_vmem [thread:$0]  (!%p609_p6), %s131_s18, 1536, %s133_s22, [#allocation6], %s799_s23, %s799_s23, %s800_s24  }
  0x11   : > { %p106_p11 = scmp.eq.s32.totalorder %s847_s19, 1  ;;  %p879_p12 = por %p41_p1, %p40_p10 }
  0x12   : > { %s875_s29 = scalar_select %p25_p8, %s792_s14, %s27_s27  }
  0x13   : > { %p883_p13 = por %p106_p11, %p34_p7  ;;  %p112_p0 = scmp.eq.s32.totalorder %s521_s25, 1 }
  0x14   : > { %p36_p2 = por %p35_p9, %p34_p7  ;;  %s149_s5 = sand.u32 1, %s792_s14  }
  0x15   : > { %p888_p4 = por %p112_p0, %p40_p10  ;;  %p621_p6 = scmp.lt.s32.totalorder %s796_s15, 2 }
  0x16   : > { %s525_s7 = sshll.u32 %s149_s5, 3  ;;  %s587_s8 = sshll.u32 %s796_s15, 3 }
  0x17   : > { %s158_s11 = scalar_lea.hbm %s972_s0, %s587_s8  ;;  %s153_s17 = scalar_lea.vmem [#allocation2], %s525_s7 }
  0x18   : > { %s160_s16 = sshll.u32 %s158_s11, 4  ;;  %s162_s18 = sshll.u32 %s153_s17, 4  ;;  %s161_s16 = int_to_ptr.hbm [resolvable:$true] %s160_s16  ;;  %s163_s18 = int_to_ptr.vmem [resolvable:$true] %s162_s18 }
  0x19   : > { %p897_p8 = pnand %p621_p6, %p36_p2  ;;  %s150_s22 = scalar_lea.sflag [#allocation3], %s149_s5 }
  0x1a   : > { %s696_s23 = sshra.s32 %s161_s16, 4  ;;  %s703_s28 = scalar_lea.hbm %s972_s0, 16  ;;  %s697_s23 = int_to_ptr.hbm [resolvable:$true] %s696_s23 }
  0x1b   : > { %s698_s24 = scalar_lea.hbm %s697_s23, 8  ;;  %p700_p9 = pneg %p897_p8 }
  0x1c   : > { %p699_p7 = scmp.ne.s32.totalorder %s697_s23, %s698_s24  ;;  %p704_p0 = scmp.lt.s32.totalorder %s697_s23, %s972_s0 }
  0x1d   : > { %p705_p2 = scmp.lt.s32.totalorder %s703_s28, %s698_s24 }
  0x1e   : > { %p701_p10 = pnand %p700_p9, %p699_p7 }
  0x1f   : > { %p706_p6 = por %p705_p2, %p704_p0 }
  0x20   : > { %p702_p11 = pneg %p701_p10 }
  0x22   : > { %p707_p5 = pnand %p706_p6, %p702_p11 }
  0x24   : > { %710 = shalt.err (!%p707_p5)
}
  0x25   : > { %615 = dma.hbm_to_vmem [thread:$0]  (!%p897_p8), %s161_s16, 128, %s163_s18, %s150_s22  }
  0x26   : > { %171 = sbr.rel (%p852_p3) target bundleno = 875 (0x36b), region = 32  ;;  %s914_s5 = sand.u32 (!%p852_p3), 1, %s788_s13  }
  0x27   : > { %s529_s9 = sshll.u32 (!%p852_p3), %s914_s5, 3  ;;  %s174_s10 = scalar_lea.sflag (!%p852_p3), [#allocation3], %s914_s5 }
  0x28   : > { %s177_s11 = scalar_lea.vmem (!%p852_p3), [#allocation2], %s529_s9 }
  0x2b   : > { %771 = dma.done.wait (%p879_p12), %s174_s10, 128  }
  0x2c   : > { %773 = vsyncadd (%p879_p12), %s174_s10, 4294967168 }
  0x2d   : > { %775 = dma.done.wait (%p41_p1), [#allocation6], 1536  }
  0x2e   : > { %777 = vsyncadd (%p41_p1), [#allocation6], 4294965760  ;;  %v595_v0 = vld [vmem:[#allocation5 + $0x38] sm:$0xff]  ;;  %v594_v2 = vld [vmem:[#allocation5 + $0x30] sm:$0xff]  ;;  %vm314_vm0 = vcmask 523264   ;;  %vm350_vm1 = vcmask 261120   ;;  %v370_v29 = vlaneseq }
  0x2f   : > { %v599_v1 = vld [vmem:[#allocation5 + $0x58] sm:$0xff]  ;;  %318 = vmatpush.bf16.msra.mxu0 %v595_v0  ;;  %v598_v3 = vld [vmem:[#allocation5 + $0x50] sm:$0xff]  ;;  %v593_v4 = vld [vmem:[#allocation5 + $0x28] sm:$0xff]  ;;  %s801_s16 = smov 96   ;;  %vm376_vm3 = vcmask 64512   ;;  %s802_s17 = smov 64  }
  0x30   : > { %335 = vmatpush.bf16.msra.mxu1 %v599_v1  ;;  %v597_v5 = vld [vmem:[#allocation5 + $0x48] sm:$0xff]  ;;  %v207_v6 = vld [vmem:[%s177_s11] sm:$0xff]  ;;  %v592_v7 = vld [vmem:[#allocation5 + $0x20] sm:$0xff]  ;;  %v371_v30 = vshrl.u32 %v370_v29, 7  ;;  %v373_v31 = vand.u32 127, %v370_v29  ;;  %vm407_vm8 = vcmask 1043456  }
  0x31   : > { %v238_v8 = vunpack.c.h.b16 %v207_v6  ;;  %v596_v9 = vld [vmem:[#allocation5 + $0x40] sm:$0xff]  ;;  %v591_v10 = vld [vmem:[#allocation5 + $0x18] sm:$0xff]  ;;  %v590_v12 = vld [vmem:[#allocation5 + $0x10] sm:$0xff]  ;;  %v237_v14 = vunpack.c.l.b16 %v207_v6  ;;  %s584_s18 = sshll.u32 %s847_s19, 3  ;;  %s205_s24 = scalar_lea.vmem [#allocation7], %s529_s9 }
  0x32   : > { %v589_v13 = vld [vmem:[#allocation5 + $0x8] sm:$0xff]  ;;  %v588_v15 = vld [vmem:[#allocation5] sm:$0xff]  ;;  %v661_v19 = vld [vmem:[%s974_s2] ss:$0 sm:$0xff]  ;;  %vm374_vm2 = vcmp.le.s32.totalorder %v373_v31, %v371_v30  ;;  %s436_s23 = scalar_lea.hbm %s975_s3, %s584_s18  ;;  %s438_s25 = sshll.u32 %s205_s24, 4  ;;  %s439_s25 = int_to_ptr.vmem [resolvable:$true] %s438_s25 }
  0x33   : > { %319 = vmatpush.bf16.msra.mxu0 %v594_v2  ;;  %v240_v11 = vpack.c.b16 %v238_v8, %v238_v8  ;;  %v239_v16 = vpack.c.b16 %v237_v14, %v237_v14  ;;  %s440_s27 = sshll.u32 %s436_s23, 4  ;;  %s426_s28 = scalar_lea.sflag [#allocation4], %s914_s5  ;;  %s441_s27 = int_to_ptr.hbm [resolvable:$true] %s440_s27 }
  0x34   : > { %336 = vmatpush.bf16.msra.mxu1 %v598_v3  ;;  %s740_s7 = sshra.s32 %s441_s27, 4  ;;  %s746_s11 = scalar_lea.hbm %s975_s3, 16  ;;  %s741_s7 = int_to_ptr.hbm [resolvable:$true] %s740_s7 }
  0x35   : > { %s742_s8 = scalar_lea.hbm %s741_s7, 8  ;;  %p747_p12 = scmp.lt.s32.totalorder %s741_s7, %s975_s3 }
  0x36   : > { %p743_p1 = scmp.ne.s32.totalorder %s741_s7, %s742_s8  ;;  %p748_p8 = scmp.lt.s32.totalorder %s746_s11, %s742_s8 }
  0x37   : > { %320 = vmatpush.bf16.msra.mxu0 %v593_v4 }
  0x38   : > { %337 = vmatpush.bf16.msra.mxu1 %v597_v5  ;;  %p744_p3 = pnand %p743_p1, %p883_p13  ;;  %p749_p7 = por %p748_p8, %p747_p12 }
  0x3a   : > { %p745_p5 = pneg %p744_p3 }
  0x3b   : > { %321 = vmatpush.bf16.msra.mxu0 %v592_v7 }
  0x3c   : > { %338 = vmatpush.bf16.msra.mxu1 %v596_v9  ;;  %p750_p9 = pnand %p749_p7, %p745_p5 }
  0x3f   : > { %322 = vmatpush.bf16.msra.mxu0 %v591_v10  ;;  %580 = vmatmul.msk.bf16.vlgmr.msra.gmra.mxu1 %vm314_vm0, %v240_v11 }
  0x43   : > { %323 = vmatpush.bf16.msra.mxu0 %v590_v12 }
  0x47   : > { %324 = vmatpush.bf16.msra.mxu0 %v589_v13 }
  0x4b   : > { %325 = vmatpush.bf16.msra.mxu0 %v588_v15 }
  0x4e   : > { %326 = vmatmul.bf16.vlgmr.msra.gmra.mxu0 %v239_v16 }
  0xbc   : > { %v340_v17 = vpop.f32.mrf.mxu1 }
  0xc4   : > { %v342_v18 = vpop.f32.mrf.mxu1 }
  0xcb   : > { %v327_v20 = vpop.f32.mrf.mxu0 }
  0xcc   : > { %v328_v21 = vadd.f32 %v661_v19, %v327_v20 }
  0xce   : > { %v341_v22 = vadd.f32 %v340_v17, %v328_v21 }
  0xd0   : > { %v344_v23 = vpack.c.bf16 %v341_v22, %v341_v22 }
  0xd2   : > { %v355_v24 = vsel %vm350_vm1, %v344_v23, 0  ;;  %v346_v25 = vunpack.c.l.b16 %v344_v23 }
  0xd3   : > { %v329_v26 = vpop.f32.mrf.mxu0  ;;  %364 = vmatpush.bf16.xpose.msra.mxu2 %v355_v24 }
  0xd4   : > { %v347_v27 = vpack.c.b16 %v346_v25, %v346_v25 }
  0xd6   : > { %348 = vrot.lane.b32.xlu0 %v347_v27, %s801_s16 }
 0x148   : > { %v349_v28 = vpop.permute.xlu0 %348 }
 0x149   : > { %581 = vmatmul.msk.bf16.vlgmr.msra.gmra.mxu2 %vm350_vm1, %v349_v28 }
 0x1cc   : > { %v366_v32 = vpop.f32.mrf.mxu2 }
 0x1cd   : > { %v375_v33 = vsel %vm374_vm2, %v366_v32, -1e+30 }
 0x1ce   : > { %v377_v34 = vsel %vm376_vm3, %v375_v33, -inf }
 0x1cf   : > { %378 = vmax.xlane.f32.xlu0 %v377_v34 }
 0x1d4   : > { %v368_v35 = vpop.f32.mrf.mxu2 }
 0x242   : > { %v379_v36 = vpop.xlane.xlu0 %378 }
 0x243   : > { %v380_v37 = vsub.f32 %v375_v33, %v379_v36 }
 0x245   : > { %v381_v38 = vmul.f32 1.442695, %v380_v37 }
 0x247   : > { %662 = vpow2.f32 %v381_v38 }
 0x24d   : > { %v663_v39 = vpop.eup %662 }
 0x24e   : > { %v383_v40 = vsel %vm376_vm3, %v663_v39, 0.0 }
 0x24f   : > { %384 = vadd.xlane.f32.xlu1 %v383_v40 }
 0x268   : > { %402 = vrot.lane.b32.xlu1 %v347_v27, %s802_s17 }
 0x2c2   : > { %v385_v41 = vpop.xlane.xlu1 %384 }
 0x2c3   : > { %664 = vrcp.f32 %v385_v41  ;;  %v397_v46 = vand.u32 2147483648, %v385_v41  ;;  %vm391_vm5 = vweird.f32 %v385_v41  ;;  %v395_v48 = vand.u32 2147483647, %v385_v41 }
 0x2c5   : > { %v398_v50 = vor.u32 1.1754944e-38, %v397_v46  ;;  %vm396_vm7 = vcmp.eq.f32.partialorder %v395_v48, 8.507059e+37 }
 0x2c9   : > { %v665_v42 = vpop.eup %664 }
 0x2ca   : > { %v387_v43 = vmul.f32 %v665_v42, %v385_v41  ;;  %vm392_vm4 = vweird.f32 %v665_v42 }
 0x2cb   : > { %vm393_vm6 = vmor %vm391_vm5, %vm392_vm4 }
 0x2cc   : > { %v388_v44 = vsub.f32 1.0, %v387_v43 }
 0x2ce   : > { %v389_v45 = vmul.f32 %v665_v42, %v388_v44 }
 0x2d0   : > { %v390_v47 = vadd.f32 %v665_v42, %v389_v45 }
 0x2d2   : > { %v394_v49 = vsel %vm393_vm6, %v665_v42, %v390_v47 }
 0x2d3   : > { %v399_v51 = vsel %vm396_vm7, %v398_v50, %v394_v49 }
 0x2d4   : > { %v400_v52 = vmul.f32 %v663_v39, %v399_v51 }
 0x2d6   : > { %v401_v55 = vpack.c.bf16 %v400_v52, %v400_v52 }
 0x2da   : > { %v403_v53 = vpop.permute.xlu1 %402 }
 0x2db   : > { %v409_v54 = vsel %vm407_vm8, %v403_v53, 0 }
 0x2dc   : > { %418 = vmatpush.bf16.msra.mxu3 %v409_v54 }
 0x2df   : > { %582 = vmatmul.msk.bf16.vlgmr.msra.gmra.mxu3 %vm376_vm3, %v401_v55 }
 0x362   : > { %v420_v56 = vpop.f32.mrf.mxu3 }
 0x363   : > { %424 = vst.msk [vmem:[%s205_s24] sm:$0xff] %vm350_vm1, %v420_v56 }
 0x364   : > { %753 = shalt.err (!%p750_p9)
}
 0x365   : > { %606 = dma.vmem_to_hbm [thread:$0]  (%p883_p13), %s439_s25, 128, %s441_s27, %s426_s28  }
 0x36a   : > { %v422_v57 = vpop.f32.mrf.mxu3 }
 0x36b PF: > { %s452_s5 = sand.u32 1, %s784_s12   ;;  %p981_p10 = scmp.ge.s32.totalorder %s796_s15, 2 }
 0x36c   : > { %s453_s30 = scalar_lea.sflag [#allocation4], %s452_s5 }
 0x36d   : > { %p617_p11 = pnand %p981_p10, %p888_p4 }
 0x36f   : > { %p618_p0 = pneg %p617_p11 }
 0x371   : > { %779 = dma.done.wait (%p618_p0), %s453_s30, 128  }
 0x372   : > { %781 = vsyncadd (%p618_p0), %s453_s30, 4294967168  ;;  %p17_p2 = scmp.ge.s32.totalorder %s863_s26, 4   ;;  %s982_s12 = smov %s788_s13 }
 0x373   : > { %s983_s13 = smov %s792_s14  ;;  %s984_s14 = smov %s875_s29 }
 0x374   : > { %s985_s15 = smov %s863_s26  ;;  %19 = sbr.rel (!%p17_p2) target bundleno = 6 (0x6), region = 81 }
 0x379   :  { %459 = vsyncpa [#allocation3], 1 }
 0x37a   :  { %461 = vsyncpa [#allocation3 + $0x1], 1 }
 0x37b   :  { %462 = vsyncpa [#allocation6], 1 }
 0x37c   :  { %463 = vsyncpa [#allocation4], 1 }
 0x37d   :  { %465 = vsyncpa [#allocation4 + $0x1], 1 }

</bundles_post_ra>
